<compile_context>
chip_gen: v7x
topology: tpu7x:2x2x1
jax: 0.10.0
libtpu: 0.0.40
codegen_flags: <defaults>
</compile_context>

<pallas_src>
import functools

import jax
import jax.numpy as jnp
from jax import lax
from jax.experimental import pallas as pl
from jax.experimental.pallas import tpu as pltpu


def _pool_kernel(x_ref, sel_ref, o_ref, *, kh, kw, W, Wo, r, mode):
    """Window-reduce one block of packed rows.

    x_ref:   (tm, r*kh*W)  -- packed row: r groups of kh input-image rows (width W)
    sel_ref: (Ws, Wo)      -- one-hot lane-compaction matrix, Ws = (Wo-1)*kw + 1
    o_ref:   (tm, r*Wo)    -- r pooled output rows packed along lanes
    """
    Ws = (Wo - 1) * kw + 1

    def combine(a, b):
        return a * b if mode == "analytic" else jnp.maximum(a, b)

    # Grid-invariant one-hot compaction matrix (loaded once per step).
    sel = sel_ref[...] if kw > 1 else None

    for g in range(r):
        base = g * kh * W
        # Combine all kh*kw window taps on the VPU using shifted contiguous
        # lane strips: acc[:, w] = combine_{ki,kj} x[:, base + ki*W + kj + w].
        # At w = ow*kw this is exactly the (kh, kw) window reduction.
        acc = None
        for ki in range(kh):
            for kj in range(kw):
                strip = x_ref[:, pl.ds(base + ki * W + kj, Ws)].astype(jnp.float32)
                acc = strip if acc is None else combine(acc, strip)

        if kw > 1:
            # Exact one-hot gather of lanes ow*kw -> ow on the otherwise idle
            # MXU.  HIGHEST precision => full-f32 contraction, so the pick is
            # bit-exact (each output column has a single 1.0).
            out_g = jnp.dot(acc, sel, precision=lax.Precision.HIGHEST,
                            preferred_element_type=jnp.float32)
        else:
            out_g = acc  # Ws == Wo, nothing to compact

        # Place this group's Wo outputs at its lane slot of the packed row.
        o_ref[:, pl.ds(g * Wo, Wo)] = out_g.astype(o_ref.dtype)


def _pad_up(v, m):
    return -(-v // m) * m


def _vmem_capacity_bytes():
    try:
        return int(pltpu.get_tpu_info().vmem_capacity_bytes)
    except Exception:  # pragma: no cover - older jax / no query available
        return 64 * 1024 * 1024  # assume the smallest generation (v7x)


@functools.partial(jax.jit, static_argnames=("kernel_size", "mode"))
def _bayes_max_pool2d_impl(x, *, kernel_size, mode):
    kh, kw = kernel_size
    B, C, H, W = x.shape
    Ho, Wo = H // kh, W // kw
    if Ho == 0 or Wo == 0:
        raise ValueError("kernel_size larger than the spatial dimensions")

    if H != Ho * kh:
        # F.unfold / F.max_pool2d silently drop trailing rows that don't fit.
        # Cropping H makes the reshape below materialize a copy; this is the
        # rare ragged-H edge case only.  Ragged W costs nothing: the shifted
        # strips below simply never read the trailing W - Wo*kw columns.
        x = x[:, :, : Ho * kh, :]
        H = Ho * kh

    M = B * C * Ho
    itemsize = jnp.dtype(x.dtype).itemsize
    Ws = (Wo - 1) * kw + 1                      # width of one shifted strip

    # --- output-lane packing: r consecutive output rows per stored row -------
    rmax = 128 // Wo if Wo < 128 else 1
    rmax = max(1, min(rmax, M // 8 if M >= 8 else M))
    r = 1
    for cand in range(min(rmax, M), 0, -1):     # largest divisor of M <= rmax
        if M % cand == 0:
            r = cand
            break
    Mr = M // r
    row_in = r * kh * W                         # input lanes per packed row
    row_out = r * Wo                            # output lanes per packed row

    # Metadata-only, row-major reshape: (B, C, Ho, kh, W) -> (Mr, r*kh*W).
    x2 = x.reshape(Mr, row_in)

    # Grid-invariant one-hot lane-compaction matrix, built once on the host
    # side of the kernel and passed with a constant index_map.
    w_idx = lax.broadcasted_iota(jnp.int32, (Ws, Wo), 0)
    o_idx = lax.broadcasted_iota(jnp.int32, (Ws, Wo), 1)
    sel = jnp.where(w_idx == o_idx * kw, 1.0, 0.0).astype(jnp.float32)

    # --- generation-aware, temporary-aware VMEM budget ------------------------
    vmem_cap = _vmem_capacity_bytes()
    vmem_limit = int(min(64 * 1024 * 1024,
                         max(32 * 1024 * 1024, 3 * vmem_cap // 4)))
    lanes_in = _pad_up(row_in, 128)
    lanes_out = _pad_up(row_out, 128)
    ws_pad = _pad_up(Ws, 128)
    wo_pad = _pad_up(Wo, 128)
    sel_bytes = 2 * _pad_up(Ws, 8) * wo_pad * 4
    # Double-buffered I/O blocks plus (conservatively, assuming no cross-group
    # buffer reuse) the in-kernel f32 temporaries per packed row.
    bytes_per_row = (2 * (lanes_in + lanes_out)) * itemsize \
        + r * (2 * ws_pad + wo_pad) * 4
    budget = max(8 * bytes_per_row,
                 vmem_limit - sel_bytes - 6 * 1024 * 1024)
    tm_budget = max(8, (budget // bytes_per_row) // 8 * 8)

    # Keep >= ~8 grid steps when the problem allows it, so the DMA pipeline has
    # depth and the "parallel" grid shards across v7x's two TensorCores.
    tm_cap = max(8, ((Mr // 8) // 8) * 8)
    tm = int(min(tm_budget, tm_cap))
    if tm >= Mr:
        tm = Mr                                  # tiny input: one full block
    grid = (pl.cdiv(Mr, tm),)

    macs = M * Ws * Wo if kw > 1 else 0
    flops = M * (kh * kw - 1) * Ws + 2 * macs
    bytes_accessed = (M * kh * W + M * Wo) * itemsize + Ws * Wo * 4

    out2 = pl.pallas_call(
        functools.partial(_pool_kernel, kh=kh, kw=kw, W=W, Wo=Wo, r=r, mode=mode),
        out_shape=jax.ShapeDtypeStruct((Mr, row_out), x.dtype),
        grid=grid,
        in_specs=[pl.BlockSpec((tm, row_in), lambda i: (i, 0)),
                  pl.BlockSpec((Ws, Wo), lambda i: (0, 0))],   # grid-invariant
        out_specs=pl.BlockSpec((tm, row_out), lambda i: (i, 0)),
        compiler_params=pltpu.CompilerParams(
            dimension_semantics=("parallel",),   # rows independent
            vmem_limit_bytes=vmem_limit,
        ),
        cost_estimate=pl.CostEstimate(flops=flops, transcendentals=0,
                                      bytes_accessed=bytes_accessed),
    )(x2, sel)

    return out2.reshape(B, C, Ho, Wo)


def bayes_max_pool2d_(x, kernel_size=2, mode="analytic"):
    """JAX/Pallas equivalent of BayesMaxPool2d_.forward."""
    ks = (kernel_size, kernel_size) if isinstance(kernel_size, int) else tuple(kernel_size)
    return _bayes_max_pool2d_impl(x, kernel_size=ks, mode=mode)


def _reference(x, kernel_size=2, mode="analytic"):
    """Pure-JAX reference of the PyTorch forward (unfold -> prod / max-pool)."""
    kh, kw = (kernel_size, kernel_size) if isinstance(kernel_size, int) else tuple(kernel_size)
    B, C, H, W = x.shape
    Ho, Wo = H // kh, W // kw
    xw = x[:, :, : Ho * kh, : Wo * kw].reshape(B, C, Ho, kh, Wo, kw)
    if mode == "analytic":
        return jnp.prod(xw, axis=(3, 5))
    return jnp.max(xw, axis=(3, 5))


if __name__ == "__main__":
    key = jax.random.PRNGKey(0)
    k0, k1 = jax.random.split(key)

    # Small NCHW input consistent with the module: batch=2, channels=4, spatial=16.
    u = jax.random.uniform(k0, (2, 4, 16, 16), dtype=jnp.float32)
    # Quantize to 4-bit significands in [0.5, 1): window products are exactly
    # representable, so the comparison against the pure-JAX reference is exact.
    x = (jnp.floor(u * 8.0) + 8.0) / 16.0

    # analytic (product-pooling) path
    out = bayes_max_pool2d_(x, kernel_size=2, mode="analytic")
    out = jax.block_until_ready(out)
    ref = _reference(x, kernel_size=2, mode="analytic")
    assert out.shape == (2, 4, 8, 8), out.shape
    assert jnp.allclose(out, ref, atol=1e-6, rtol=1e-5), \
        float(jnp.max(jnp.abs(out - ref)))

    # 'sampling' / 'MAP' path (plain max-pooling)
    out_mp = bayes_max_pool2d_(x, kernel_size=2, mode="MAP")
    out_mp = jax.block_until_ready(out_mp)
    ref_mp = _reference(x, kernel_size=2, mode="MAP")
    assert jnp.allclose(out_mp, ref_mp, atol=1e-6, rtol=1e-5)

    # odd spatial size (non-128-friendly lanes, ragged last grid block)
    u2 = jax.random.uniform(k1, (2, 3, 10, 14), dtype=jnp.float32)
    x_odd = (jnp.floor(u2 * 8.0) + 8.0) / 16.0
    out_odd = jax.block_until_ready(bayes_max_pool2d_(x_odd, kernel_size=2,
                                                      mode="analytic"))
    ref_odd = _reference(x_odd, kernel_size=2, mode="analytic")
    assert out_odd.shape == (2, 3, 5, 7), out_odd.shape
    assert jnp.allclose(out_odd, ref_odd, atol=1e-6, rtol=1e-5), \
        float(jnp.max(jnp.abs(out_odd - ref_odd)))

    print("KERNEL_OK")
</pallas_src>

<mosaic_0001>
module attributes {stable_mosaic.version = 11 : i64} {
  func.func @_pool_kernel(%arg0: i32, %arg1: memref<8x256xf32, #tpu.memory_space<vmem>>, %arg2: memref<15x8xf32, #tpu.memory_space<vmem>>, %arg3: memref<8x64xf32, #tpu.memory_space<vmem>>) attributes {dimension_semantics = [#tpu.dimension_semantics<parallel>], iteration_bounds = array<i64: 1>, scalar_prefetch = 0 : i64, scratch_operands = 0 : i64, tpu.core_type = #tpu.core_type<tc>, window_params = [{transform_indices = @transform_0, window_bounds = array<i64: 8, 256>}, {pipeline_mode = #tpu.pipeline_mode<synchronous>, transform_indices = @transform_1, window_bounds = array<i64: 15, 8>}, {transform_indices = @transform_2, window_bounds = array<i64: 8, 64>}]} {
    %c0 = arith.constant 0 : index
    %c0_0 = arith.constant 0 : index
    %0 = vector.load %arg2[%c0, %c0_0] : memref<15x8xf32, #tpu.memory_space<vmem>>, vector<15x8xf32>
    %c0_1 = arith.constant 0 : index
    %c0_2 = arith.constant 0 : index
    %1 = vector.load %arg1[%c0_1, %c0_2] : memref<8x256xf32, #tpu.memory_space<vmem>>, vector<8x15xf32>
    %c0_3 = arith.constant 0 : index
    %c1 = arith.constant 1 : index
    %2 = vector.load %arg1[%c0_3, %c1] : memref<8x256xf32, #tpu.memory_space<vmem>>, vector<8x15xf32>
    %3 = arith.mulf %1, %2 : vector<8x15xf32>
    %c0_4 = arith.constant 0 : index
    %c16 = arith.constant 16 : index
    %4 = vector.load %arg1[%c0_4, %c16] : memref<8x256xf32, #tpu.memory_space<vmem>>, vector<8x15xf32>
    %5 = arith.mulf %3, %4 : vector<8x15xf32>
    %c0_5 = arith.constant 0 : index
    %c17 = arith.constant 17 : index
    %6 = vector.load %arg1[%c0_5, %c17] : memref<8x256xf32, #tpu.memory_space<vmem>>, vector<8x15xf32>
    %7 = arith.mulf %5, %6 : vector<8x15xf32>
    %cst = arith.constant dense<0.000000e+00> : vector<8x8xf32>
    %8 = tpu.matmul %7, %0, %cst {dimension_numbers = #tpu.dot_dimension_numbers<[1], [0], [0], [1], [0, 0, 1, 1], [], []>, precision = #tpu.contract_precision<fp32>} : vector<8x15xf32>, vector<15x8xf32>, vector<8x8xf32> -> vector<8x8xf32>
    %c0_6 = arith.constant 0 : index
    %c0_7 = arith.constant 0 : index
    %9 = vector.load %arg3[%c0_6, %c0_7] : memref<8x64xf32, #tpu.memory_space<vmem>>, vector<8x8xf32>
    tpu.vector_store %arg3[%c0_6, %c0_7], %8 {strides = array<i32>} : memref<8x64xf32, #tpu.memory_space<vmem>>, vector<8x8xf32>,
    %c0_8 = arith.constant 0 : index
    %c32 = arith.constant 32 : index
    %10 = vector.load %arg1[%c0_8, %c32] : memref<8x256xf32, #tpu.memory_space<vmem>>, vector<8x15xf32>
    %c0_9 = arith.constant 0 : index
    %c33 = arith.constant 33 : index
    %11 = vector.load %arg1[%c0_9, %c33] : memref<8x256xf32, #tpu.memory_space<vmem>>, vector<8x15xf32>
    %12 = arith.mulf %10, %11 : vector<8x15xf32>
    %c0_10 = arith.constant 0 : index
    %c48 = arith.constant 48 : index
    %13 = vector.load %arg1[%c0_10, %c48] : memref<8x256xf32, #tpu.memory_space<vmem>>, vector<8x15xf32>
    %14 = arith.mulf %12, %13 : vector<8x15xf32>
    %c0_11 = arith.constant 0 : index
    %c49 = arith.constant 49 : index
    %15 = vector.load %arg1[%c0_11, %c49] : memref<8x256xf32, #tpu.memory_space<vmem>>, vector<8x15xf32>
    %16 = arith.mulf %14, %15 : vector<8x15xf32>
    %cst_12 = arith.constant dense<0.000000e+00> : vector<8x8xf32>
    %17 = tpu.matmul %16, %0, %cst_12 {dimension_numbers = #tpu.dot_dimension_numbers<[1], [0], [0], [1], [0, 0, 1, 1], [], []>, precision = #tpu.contract_precision<fp32>} : vector<8x15xf32>, vector<15x8xf32>, vector<8x8xf32> -> vector<8x8xf32>
    %c0_13 = arith.constant 0 : index
    %c8 = arith.constant 8 : index
    %18 = vector.load %arg3[%c0_13, %c8] : memref<8x64xf32, #tpu.memory_space<vmem>>, vector<8x8xf32>
    tpu.vector_store %arg3[%c0_13, %c8], %17 {strides = array<i32>} : memref<8x64xf32, #tpu.memory_space<vmem>>, vector<8x8xf32>,
    %c0_14 = arith.constant 0 : index
    %c64 = arith.constant 64 : index
    %19 = vector.load %arg1[%c0_14, %c64] : memref<8x256xf32, #tpu.memory_space<vmem>>, vector<8x15xf32>
    %c0_15 = arith.constant 0 : index
    %c65 = arith.constant 65 : index
    %20 = vector.load %arg1[%c0_15, %c65] : memref<8x256xf32, #tpu.memory_space<vmem>>, vector<8x15xf32>
    %21 = arith.mulf %19, %20 : vector<8x15xf32>
    %c0_16 = arith.constant 0 : index
    %c80 = arith.constant 80 : index
    %22 = vector.load %arg1[%c0_16, %c80] : memref<8x256xf32, #tpu.memory_space<vmem>>, vector<8x15xf32>
    %23 = arith.mulf %21, %22 : vector<8x15xf32>
    %c0_17 = arith.constant 0 : index
    %c81 = arith.constant 81 : index
    %24 = vector.load %arg1[%c0_17, %c81] : memref<8x256xf32, #tpu.memory_space<vmem>>, vector<8x15xf32>
    %25 = arith.mulf %23, %24 : vector<8x15xf32>
    %cst_18 = arith.constant dense<0.000000e+00> : vector<8x8xf32>
    %26 = tpu.matmul %25, %0, %cst_18 {dimension_numbers = #tpu.dot_dimension_numbers<[1], [0], [0], [1], [0, 0, 1, 1], [], []>, precision = #tpu.contract_precision<fp32>} : vector<8x15xf32>, vector<15x8xf32>, vector<8x8xf32> -> vector<8x8xf32>
    %c0_19 = arith.constant 0 : index
    %c16_20 = arith.constant 16 : index
    %27 = vector.load %arg3[%c0_19, %c16_20] : memref<8x64xf32, #tpu.memory_space<vmem>>, vector<8x8xf32>
    tpu.vector_store %arg3[%c0_19, %c16_20], %26 {strides = array<i32>} : memref<8x64xf32, #tpu.memory_space<vmem>>, vector<8x8xf32>,
    %c0_21 = arith.constant 0 : index
    %c96 = arith.constant 96 : index
    %28 = vector.load %arg1[%c0_21, %c96] : memref<8x256xf32, #tpu.memory_space<vmem>>, vector<8x15xf32>
    %c0_22 = arith.constant 0 : index
    %c97 = arith.constant 97 : index
    %29 = vector.load %arg1[%c0_22, %c97] : memref<8x256xf32, #tpu.memory_space<vmem>>, vector<8x15xf32>
    %30 = arith.mulf %28, %29 : vector<8x15xf32>
    %c0_23 = arith.constant 0 : index
    %c112 = arith.constant 112 : index
    %31 = vector.load %arg1[%c0_23, %c112] : memref<8x256xf32, #tpu.memory_space<vmem>>, vector<8x15xf32>
    %32 = arith.mulf %30, %31 : vector<8x15xf32>
    %c0_24 = arith.constant 0 : index
    %c113 = arith.constant 113 : index
    %33 = vector.load %arg1[%c0_24, %c113] : memref<8x256xf32, #tpu.memory_space<vmem>>, vector<8x15xf32>
    %34 = arith.mulf %32, %33 : vector<8x15xf32>
    %cst_25 = arith.constant dense<0.000000e+00> : vector<8x8xf32>
    %35 = tpu.matmul %34, %0, %cst_25 {dimension_numbers = #tpu.dot_dimension_numbers<[1], [0], [0], [1], [0, 0, 1, 1], [], []>, precision = #tpu.contract_precision<fp32>} : vector<8x15xf32>, vector<15x8xf32>, vector<8x8xf32> -> vector<8x8xf32>
    %c0_26 = arith.constant 0 : index
    %c24 = arith.constant 24 : index
    %36 = vector.load %arg3[%c0_26, %c24] : memref<8x64xf32, #tpu.memory_space<vmem>>, vector<8x8xf32>
    tpu.vector_store %arg3[%c0_26, %c24], %35 {strides = array<i32>} : memref<8x64xf32, #tpu.memory_space<vmem>>, vector<8x8xf32>,
    %c0_27 = arith.constant 0 : index
    %c128 = arith.constant 128 : index
    %37 = vector.load %arg1[%c0_27, %c128] : memref<8x256xf32, #tpu.memory_space<vmem>>, vector<8x15xf32>
    %c0_28 = arith.constant 0 : index
    %c129 = arith.constant 129 : index
    %38 = vector.load %arg1[%c0_28, %c129] : memref<8x256xf32, #tpu.memory_space<vmem>>, vector<8x15xf32>
    %39 = arith.mulf %37, %38 : vector<8x15xf32>
    %c0_29 = arith.constant 0 : index
    %c144 = arith.constant 144 : index
    %40 = vector.load %arg1[%c0_29, %c144] : memref<8x256xf32, #tpu.memory_space<vmem>>, vector<8x15xf32>
    %41 = arith.mulf %39, %40 : vector<8x15xf32>
    %c0_30 = arith.constant 0 : index
    %c145 = arith.constant 145 : index
    %42 = vector.load %arg1[%c0_30, %c145] : memref<8x256xf32, #tpu.memory_space<vmem>>, vector<8x15xf32>
    %43 = arith.mulf %41, %42 : vector<8x15xf32>
    %cst_31 = arith.constant dense<0.000000e+00> : vector<8x8xf32>
    %44 = tpu.matmul %43, %0, %cst_31 {dimension_numbers = #tpu.dot_dimension_numbers<[1], [0], [0], [1], [0, 0, 1, 1], [], []>, precision = #tpu.contract_precision<fp32>} : vector<8x15xf32>, vector<15x8xf32>, vector<8x8xf32> -> vector<8x8xf32>
    %c0_32 = arith.constant 0 : index
    %c32_33 = arith.constant 32 : index
    %45 = vector.load %arg3[%c0_32, %c32_33] : memref<8x64xf32, #tpu.memory_space<vmem>>, vector<8x8xf32>
    tpu.vector_store %arg3[%c0_32, %c32_33], %44 {strides = array<i32>} : memref<8x64xf32, #tpu.memory_space<vmem>>, vector<8x8xf32>,
    %c0_34 = arith.constant 0 : index
    %c160 = arith.constant 160 : index
    %46 = vector.load %arg1[%c0_34, %c160] : memref<8x256xf32, #tpu.memory_space<vmem>>, vector<8x15xf32>
    %c0_35 = arith.constant 0 : index
    %c161 = arith.constant 161 : index
    %47 = vector.load %arg1[%c0_35, %c161] : memref<8x256xf32, #tpu.memory_space<vmem>>, vector<8x15xf32>
    %48 = arith.mulf %46, %47 : vector<8x15xf32>
    %c0_36 = arith.constant 0 : index
    %c176 = arith.constant 176 : index
    %49 = vector.load %arg1[%c0_36, %c176] : memref<8x256xf32, #tpu.memory_space<vmem>>, vector<8x15xf32>
    %50 = arith.mulf %48, %49 : vector<8x15xf32>
    %c0_37 = arith.constant 0 : index
    %c177 = arith.constant 177 : index
    %51 = vector.load %arg1[%c0_37, %c177] : memref<8x256xf32, #tpu.memory_space<vmem>>, vector<8x15xf32>
    %52 = arith.mulf %50, %51 : vector<8x15xf32>
    %cst_38 = arith.constant dense<0.000000e+00> : vector<8x8xf32>
    %53 = tpu.matmul %52, %0, %cst_38 {dimension_numbers = #tpu.dot_dimension_numbers<[1], [0], [0], [1], [0, 0, 1, 1], [], []>, precision = #tpu.contract_precision<fp32>} : vector<8x15xf32>, vector<15x8xf32>, vector<8x8xf32> -> vector<8x8xf32>
    %c0_39 = arith.constant 0 : index
    %c40 = arith.constant 40 : index
    %54 = vector.load %arg3[%c0_39, %c40] : memref<8x64xf32, #tpu.memory_space<vmem>>, vector<8x8xf32>
    tpu.vector_store %arg3[%c0_39, %c40], %53 {strides = array<i32>} : memref<8x64xf32, #tpu.memory_space<vmem>>, vector<8x8xf32>,
    %c0_40 = arith.constant 0 : index
    %c192 = arith.constant 192 : index
    %55 = vector.load %arg1[%c0_40, %c192] : memref<8x256xf32, #tpu.memory_space<vmem>>, vector<8x15xf32>
    %c0_41 = arith.constant 0 : index
    %c193 = arith.constant 193 : index
    %56 = vector.load %arg1[%c0_41, %c193] : memref<8x256xf32, #tpu.memory_space<vmem>>, vector<8x15xf32>
    %57 = arith.mulf %55, %56 : vector<8x15xf32>
    %c0_42 = arith.constant 0 : index
    %c208 = arith.constant 208 : index
    %58 = vector.load %arg1[%c0_42, %c208] : memref<8x256xf32, #tpu.memory_space<vmem>>, vector<8x15xf32>
    %59 = arith.mulf %57, %58 : vector<8x15xf32>
    %c0_43 = arith.constant 0 : index
    %c209 = arith.constant 209 : index
    %60 = vector.load %arg1[%c0_43, %c209] : memref<8x256xf32, #tpu.memory_space<vmem>>, vector<8x15xf32>
    %61 = arith.mulf %59, %60 : vector<8x15xf32>
    %cst_44 = arith.constant dense<0.000000e+00> : vector<8x8xf32>
    %62 = tpu.matmul %61, %0, %cst_44 {dimension_numbers = #tpu.dot_dimension_numbers<[1], [0], [0], [1], [0, 0, 1, 1], [], []>, precision = #tpu.contract_precision<fp32>} : vector<8x15xf32>, vector<15x8xf32>, vector<8x8xf32> -> vector<8x8xf32>
    %c0_45 = arith.constant 0 : index
    %c48_46 = arith.constant 48 : index
    %63 = vector.load %arg3[%c0_45, %c48_46] : memref<8x64xf32, #tpu.memory_space<vmem>>, vector<8x8xf32>
    tpu.vector_store %arg3[%c0_45, %c48_46], %62 {strides = array<i32>} : memref<8x64xf32, #tpu.memory_space<vmem>>, vector<8x8xf32>,
    %c0_47 = arith.constant 0 : index
    %c224 = arith.constant 224 : index
    %64 = vector.load %arg1[%c0_47, %c224] : memref<8x256xf32, #tpu.memory_space<vmem>>, vector<8x15xf32>
    %c0_48 = arith.constant 0 : index
    %c225 = arith.constant 225 : index
    %65 = vector.load %arg1[%c0_48, %c225] : memref<8x256xf32, #tpu.memory_space<vmem>>, vector<8x15xf32>
    %66 = arith.mulf %64, %65 : vector<8x15xf32>
    %c0_49 = arith.constant 0 : index
    %c240 = arith.constant 240 : index
    %67 = vector.load %arg1[%c0_49, %c240] : memref<8x256xf32, #tpu.memory_space<vmem>>, vector<8x15xf32>
    %68 = arith.mulf %66, %67 : vector<8x15xf32>
    %c0_50 = arith.constant 0 : index
    %c241 = arith.constant 241 : index
    %69 = vector.load %arg1[%c0_50, %c241] : memref<8x256xf32, #tpu.memory_space<vmem>>, vector<8x15xf32>
    %70 = arith.mulf %68, %69 : vector<8x15xf32>
    %cst_51 = arith.constant dense<0.000000e+00> : vector<8x8xf32>
    %71 = tpu.matmul %70, %0, %cst_51 {dimension_numbers = #tpu.dot_dimension_numbers<[1], [0], [0], [1], [0, 0, 1, 1], [], []>, precision = #tpu.contract_precision<fp32>} : vector<8x15xf32>, vector<15x8xf32>, vector<8x8xf32> -> vector<8x8xf32>
    %c0_52 = arith.constant 0 : index
    %c56 = arith.constant 56 : index
    %72 = vector.load %arg3[%c0_52, %c56] : memref<8x64xf32, #tpu.memory_space<vmem>>, vector<8x8xf32>
    tpu.vector_store %arg3[%c0_52, %c56], %71 {strides = array<i32>} : memref<8x64xf32, #tpu.memory_space<vmem>>, vector<8x8xf32>,
    return
  }
  func.func @transform_0(%arg0: i32) -> (i32, i32) {
    %c0_i32 = arith.constant 0 : i32
    %c0_i32_0 = arith.constant 0 : i32
    return %arg0, %c0_i32 : i32, i32
  }
  func.func @transform_1(%arg0: i32) -> (i32, i32) {
    %c0_i32 = arith.constant 0 : i32
    %c0_i32_0 = arith.constant 0 : i32
    %c0_i32_1 = arith.constant 0 : i32
    return %c0_i32, %c0_i32_0 : i32, i32
  }
  func.func @transform_2(%arg0: i32) -> (i32, i32) {
    %c0_i32 = arith.constant 0 : i32
    %c0_i32_0 = arith.constant 0 : i32
    return %arg0, %c0_i32 : i32, i32
  }
}

</mosaic_0001>

<bundles_post_ra>
// kernel: _bayes_max_pool2d_impl.1
= control target key start
LH: loop header
LB: loop body
LE: loop exit
PB: predicated region body
PF: predicated region fallthrough
CT: control target
= control target key end

     0   :  { %s4605_s11 = smov 127   ;;  %s4606_s12 = smov 111   ;;  %vm31_vm0 = vcmask 1046528   ;;  %v4608_v2 = vmov 0.0|0.0   ;;  %vm4609_vm1 = vmmov 0   ;;  %v4610_v7 = vmov 0.0   ;;  %s4976_s0 = inlined_call_operand.vmem [shape: f32[8,256], index: 0, kind: input, shape index: {}]   ;;  %s4977_s1 = inlined_call_operand.vmem [shape: f32[15,8], index: 1, kind: input, shape index: {}]   ;;  %s4978_s2 = inlined_call_operand.vmem [shape: f32[8,64], index: 2, kind: output, shape index: {}]  }
   0x1   :  { %v4638_v0 = vld [vmem:[%s4976_s0] sm:$0xff]  ;;  %s4607_s13 = smov 112   ;;  %v4667_v1 = vld [vmem:[%s4976_s0 + $0x8] sm:$0xff]  ;;  %4366 = vmatprep.subr.bf16.mxu0 %v4608_v2  ;;  %4034 = vmatprep.mubr.msk.f32.mxu0 %vm4609_vm1, %v4610_v7  ;;  %s4611_s0 = smov 96   ;;  %vm27_vm2 = vcmask 121856   ;;  %vm494_vm3 = vcmask 64512  }
   0x2   :  { %498 = vrot.lane.b32.xlu0 %v4638_v0, %s4605_s11  ;;  %506 = vrot.lane.b32.xlu1 %v4638_v0, %s4606_s12  ;;  %v11_v3 = vld [vmem:[%s4977_s1] sm:$0xff]  ;;  %v12_v4 = vld [vmem:[%s4977_s1 + $0x8] sm:$0x7f]  ;;  %s4612_s1 = smov 64   ;;  %s4613_s20 = smov 32   ;;  %vm978_vm4 = vcmask 130112  }
   0x3   :  { %v33_v5 = vsel %vm31_vm0, %v12_v4, 0  ;;  %v36_v6 = vand.u32 4294901760, %v11_v3  ;;  %4384 = vmatprep.subr.bf16.mxu1 %v4608_v2  ;;  %4076 = vmatprep.mubr.msk.f32.mxu1 %vm4609_vm1, %v4610_v7  ;;  %s4614_s23 = smov 8   ;;  %s4615_s24 = smov 16   ;;  %vm1462_vm5 = vcmask 195712   ;;  %vm1946_vm6 = vcmask 261312  }
   0x4   :  { %v39_v8 = vand.u32 4294901760, %v33_v5  ;;  %s4616_s25 = smov 24   ;;  %s4617_s30 = smov 40   ;;  %vm2428_vm7 = vcmask 326912   ;;  %vm2912_vm8 = vcmask 392512   ;;  %vm3396_vm9 = vcmask 458112  }
   0x5   :  { %v114_v9 = vsub.f32 %v11_v3, %v36_v6  ;;  %s4618_s3 = smov 48   ;;  %s4619_s6 = smov 56   ;;  %vm3880_vm10 = vcmask 523712  }
   0x6   :  { %502 = vrot.lane.b32.xlu0 %v4638_v0, %s4607_s13  ;;  %982 = vrot.lane.b32.xlu1 %v4638_v0, %s4605_s11  ;;  %v4685_v10 = vpack.c.bf16 %v39_v8, %v36_v6  ;;  %v121_v11 = vsub.f32 %v33_v5, %v39_v8 }
   0x7   :  { %v115_v12 = vand.u32 4294901760, %v114_v9 }
   0x8   :  { %4368 = vmatpush3.bf16.msra.mxu0 %v4685_v10  ;;  %v122_v13 = vand.u32 4294901760, %v121_v11  ;;  %v4688_v14 = vpack.c.bf16 %v121_v11, %v114_v9  ;;  %4386 = vmatpush3.bf16.msra.mxu1 %v4685_v10 }
   0x9   :  { %4369 = vmatprep.subr.bf16.mxu0 %v4608_v2  ;;  %v116_v15 = vsub.f32 %v114_v9, %v115_v12  ;;  %4387 = vmatprep.subr.bf16.mxu1 %v4608_v2 }
   0xa   :  { %986 = vrot.lane.b32.xlu1 %v4638_v0, %s4607_s13  ;;  %1466 = vrot.lane.b32.xlu0 %v4638_v0, %s4605_s11  ;;  %v123_v16 = vsub.f32 %v121_v11, %v122_v13  ;;  %v4695_v20 = vpack.c.bf16 %v122_v13, %v115_v12 }
   0xb   :  { %v117_v17 = vand.u32 4294901760, %v116_v15 }
   0xc   :  { %v124_v18 = vand.u32 4294901760, %v123_v16 }
   0xe   :  { %990 = vrot.lane.b32.xlu1 %v4638_v0, %s4606_s12  ;;  %1470 = vrot.lane.b32.xlu0 %v4638_v0, %s4607_s13  ;;  %v4693_v19 = vpack.c.bf16 %v124_v18, %v117_v17 }
  0x12   :  { %1474 = vrot.lane.b32.xlu0 %v4638_v0, %s4606_s12  ;;  %15 = vrot.lane.b32.xlu1 %v4638_v0, %s4605_s11 }
  0x16   :  { %19 = vrot.lane.b32.xlu0 %v4638_v0, %s4607_s13  ;;  %23 = vrot.lane.b32.xlu1 %v4638_v0, %s4606_s12 }
  0x1a   :  { %2432 = vrot.lane.b32.xlu1 %v4667_v1, %s4605_s11 }
  0x1e   :  { %2440 = vrot.lane.b32.xlu1 %v4667_v1, %s4606_s12 }
  0x74   :  { %v499_v21 = vpop.permute.xlu0 %498  ;;  %v507_v22 = vpop.permute.xlu1 %506 }
  0x75   :  { %v501_v23 = vmul.f32 %v499_v21, %v4638_v0 }
  0x78   :  { %v503_v24 = vpop.permute.xlu0 %502  ;;  %v983_v25 = vpop.permute.xlu1 %982 }
  0x79   :  { %v505_v26 = vmul.f32 %v503_v24, %v501_v23  ;;  %v985_v27 = vmul.f32 %v983_v25, %v4638_v0 }
  0x7b   :  { %v509_v28 = vmul.f32 %v507_v22, %v505_v26 }
  0x7c   :  { %v987_v29 = vpop.permute.xlu1 %986  ;;  %v1467_v30 = vpop.permute.xlu0 %1466 }
  0x7d   :  { %511 = vrot.lane.b32.xlu0 %v509_v28, %s4611_s0  ;;  %v989_v31 = vmul.f32 %v987_v29, %v985_v27  ;;  %v1469_v32 = vmul.f32 %v1467_v30, %v4638_v0 }
  0x80   :  { %v991_v33 = vpop.permute.xlu1 %990  ;;  %v1471_v34 = vpop.permute.xlu0 %1470 }
  0x81   :  { %2436 = vrot.lane.b32.xlu0 %v4667_v1, %s4607_s13  ;;  %v993_v35 = vmul.f32 %v991_v33, %v989_v31  ;;  %v1473_v36 = vmul.f32 %v1471_v34, %v1469_v32 }
  0x84   :  { %v1475_v37 = vpop.permute.xlu0 %1474  ;;  %v16_v38 = vpop.permute.xlu1 %15 }
  0x85   :  { %995 = vrot.lane.b32.xlu0 %v993_v35, %s4612_s1  ;;  %v1477_v39 = vmul.f32 %v1475_v37, %v1473_v36  ;;  %v18_v40 = vmul.f32 %v4638_v0, %v16_v38 }
  0x87   :  { %1479 = vrot.lane.b32.xlu1 %v1477_v39, %s4613_s20 }
  0x88   :  { %v20_v41 = vpop.permute.xlu0 %19  ;;  %v24_v42 = vpop.permute.xlu1 %23 }
  0x89   :  { %2916 = vrot.lane.b32.xlu0 %v4667_v1, %s4605_s11  ;;  %v22_v43 = vmul.f32 %v20_v41, %v18_v40 }
  0x8b   :  { %3400 = vrot.lane.b32.xlu1 %v4667_v1, %s4605_s11  ;;  %v26_v44 = vmul.f32 %v24_v42, %v22_v43 }
  0x8c   :  { %v2433_v51 = vpop.permute.xlu1 %2432 }
  0x8d   :  { %2920 = vrot.lane.b32.xlu0 %v4667_v1, %s4607_s13  ;;  %v29_v45 = vsel %vm27_vm2, %v26_v44, 0  ;;  %v2435_v54 = vmul.f32 %v2433_v51, %v4667_v1 }
  0x8e   :  { %v102_v46 = vand.u32 4294901760, %v29_v45 }
  0x8f   :  { %3404 = vrot.lane.b32.xlu1 %v4667_v1, %s4607_s13 }
  0x90   :  { %v103_v47 = vsub.f32 %v29_v45, %v102_v46  ;;  %v2441_v58 = vpop.permute.xlu1 %2440 }
  0x91   :  { %2924 = vrot.lane.b32.xlu0 %v4667_v1, %s4606_s12 }
  0x92   :  { %v104_v48 = vand.u32 4294901760, %v103_v47 }
  0x93   :  { %3408 = vrot.lane.b32.xlu1 %v4667_v1, %s4606_s12 }
  0x94   :  { %v105_v49 = vsub.f32 %v103_v47, %v104_v48 }
  0x95   :  { %1950 = vrot.lane.b32.xlu0 %v4667_v1, %s4605_s11 }
  0x96   :  { %v106_v50 = vand.u32 4294901760, %v105_v49 }
  0x97   :  { %1954 = vrot.lane.b32.xlu1 %v4667_v1, %s4607_s13 }
  0x98   :  { %4035 = vmatmul.mubr.f32.vlgmr.msra.gmra.mrb[0].mxu0 %v106_v50 }
  0x99   :  { %1958 = vrot.lane.b32.xlu0 %v4667_v1, %s4606_s12  ;;  %4371 = vmatpush3.bf16.msra.mxu0 %v4693_v19 }
  0x9a   :  { %4041 = vmatprep.mubr.msk.f32.mxu0 %vm4609_vm1, %v4610_v7  ;;  %4372 = vmatprep.subr.bf16.mxu0 %v4608_v2 }
  0xa0   :  { %4042 = vmatmul.mubr.f32.vlgmr.msra.gmra.mrb[0].mxu0 %v102_v46 }
  0xa1   :  { %4374 = vmatpush3.bf16.msra.mxu0 %v4688_v14  ;;  %4048 = vmatprep.mubr.msk.f32.mxu0 %vm4609_vm1, %v4610_v7 }
  0xa2   :  { %4375 = vmatprep.subr.bf16.mxu0 %v4608_v2 }
  0xa8   :  { %4049 = vmatmul.mubr.f32.vlgmr.msra.gmra.mrb[0].mxu0 %v103_v47 }
  0xa9   :  { %4377 = vmatpush3.bf16.msra.mxu0 %v4685_v10  ;;  %4055 = vmatprep.mubr.msk.f32.mxu0 %vm4609_vm1, %v4610_v7 }
  0xaa   :  { %4378 = vmatprep.subr.bf16.mxu0 %v4608_v2 }
  0xb0   :  { %4056 = vmatmul.mubr.f32.vlgmr.msra.gmra.mrb[0].mxu0 %v104_v48 }
  0xb1   :  { %4380 = vmatpush3.bf16.msra.mxu0 %v4695_v20  ;;  %4062 = vmatprep.mubr.msk.f32.mxu0 %vm4609_vm1, %v4610_v7 }
  0xb2   :  { %4381 = vmatprep.subr.bf16.mxu0 %v4608_v2 }
  0xb8   :  { %4063 = vmatmul.mubr.f32.vlgmr.msra.gmra.mrb[0].mxu0 %v102_v46 }
  0xb9   :  { %4383 = vmatpush3.bf16.msra.mxu0 %v4685_v10  ;;  %4069 = vmatprep.mubr.msk.f32.mxu0 %vm4609_vm1, %v4610_v7 }
  0xba   :  { %4402 = vmatprep.subr.bf16.mxu0 %v4608_v2 }
  0xc0   :  { %4070 = vmatmul.mubr.f32.vlgmr.msra.gmra.mrb[0].mxu0 %v102_v46 }
  0xc1   :  { %4404 = vmatpush3.bf16.msra.mxu0 %v4685_v10  ;;  %4118 = vmatprep.mubr.msk.f32.mxu0 %vm4609_vm1, %v4610_v7 }
  0xc2   :  { %4405 = vmatprep.subr.bf16.mxu0 %v4608_v2 }
  0xef   :  { %v512_v52 = vpop.permute.xlu0 %511 }
  0xf0   :  { %v513_v53 = vsel %vm27_vm2, %v512_v52, 0 }
  0xf1   :  { %v4751_v55 = vand.u32 4294901760, %v513_v53 }
  0xf3   :  { %v583_v56 = vsub.f32 %v513_v53, %v4751_v55  ;;  %v2437_v57 = vpop.permute.xlu0 %2436 }
  0xf4   :  { %v2439_v59 = vmul.f32 %v2437_v57, %v2435_v54 }
  0xf5   :  { %v584_v60 = vand.u32 4294901760, %v583_v56 }
  0xf6   :  { %v2443_v61 = vmul.f32 %v2441_v58, %v2439_v59 }
  0xf7   :  { %v996_v62 = vpop.permute.xlu0 %995  ;;  %v585_v63 = vsub.f32 %v583_v56, %v584_v60 }
  0xf8   :  { %v997_v0 = vsel %vm27_vm2, %v996_v62, 0  ;;  %2445 = vrot.lane.b32.xlu1 %v2443_v61, %s4611_s0 }
  0xf9   :  { %v4756_v3 = vand.u32 4294901760, %v997_v0  ;;  %v586_v4 = vand.u32 4294901760, %v585_v63  ;;  %v1480_v5 = vpop.permute.xlu1 %1479 }
  0xfa   :  { %v1481_v32 = vsel %vm27_vm2, %v1480_v5, 0 }
  0xfb   :  { %v1067_v6 = vsub.f32 %v997_v0, %v4756_v3  ;;  %4077 = vmatmul.mubr.f32.vlgmr.msra.gmra.mrb[0].mxu1 %v586_v4  ;;  %v2917_v8 = vpop.permute.xlu0 %2916  ;;  %v4789_v33 = vand.u32 4294901760, %v1481_v32 }
  0xfc   :  { %v2919_v9 = vmul.f32 %v2917_v8, %v4667_v1  ;;  %4389 = vmatpush3.bf16.msra.mxu1 %v4693_v19  ;;  %4083 = vmatprep.mubr.msk.f32.mxu1 %vm4609_vm1, %v4610_v7 }
  0xfd   :  { %v1068_v11 = vand.u32 4294901760, %v1067_v6  ;;  %4390 = vmatprep.subr.bf16.mxu1 %v4608_v2  ;;  %v3401_v12 = vpop.permute.xlu1 %3400  ;;  %v1551_v35 = vsub.f32 %v1481_v32, %v4789_v33 }
  0xfe   :  { %v3403_v13 = vmul.f32 %v3401_v12, %v4667_v1 }
  0xff   :  { %v1069_v15 = vsub.f32 %v1067_v6, %v1068_v11  ;;  %v2921_v16 = vpop.permute.xlu0 %2920  ;;  %v1552_v37 = vand.u32 4294901760, %v1551_v35 }
 0x100   :  { %v2923_v17 = vmul.f32 %v2921_v16, %v2919_v9 }
 0x101   :  { %v1070_v18 = vand.u32 4294901760, %v1069_v15  ;;  %v3405_v21 = vpop.permute.xlu1 %3404  ;;  %v1553_v39 = vsub.f32 %v1551_v35, %v1552_v37 }
 0x102   :  { %v3407_v22 = vmul.f32 %v3405_v21, %v3403_v13 }
 0x103   :  { %4084 = vmatmul.mubr.f32.vlgmr.msra.gmra.mrb[0].mxu1 %v4751_v55  ;;  %v2925_v23 = vpop.permute.xlu0 %2924  ;;  %4119 = vmatmul.mubr.f32.vlgmr.msra.gmra.mrb[2].mxu0 %v1070_v18  ;;  %v1554_v41 = vand.u32 4294901760, %v1553_v39 }
 0x104   :  { %v2927_v24 = vmul.f32 %v2925_v23, %v2923_v17  ;;  %4392 = vmatpush3.bf16.msra.mxu1 %v4688_v14  ;;  %4407 = vmatpush3.bf16.msra.mxu0 %v4693_v19 }
 0x105   :  { %4090 = vmatprep.mubr.msk.f32.mxu1 %vm4609_vm1, %v4610_v7  ;;  %4125 = vmatprep.mubr.msk.f32.mxu0 %vm4609_vm1, %v4610_v7  ;;  %v3409_v25 = vpop.permute.xlu1 %3408 }
 0x106   :  { %2929 = vrot.lane.b32.xlu0 %v2927_v24, %s4612_s1  ;;  %4393 = vmatprep.subr.bf16.mxu1 %v4608_v2  ;;  %v3411_v26 = vmul.f32 %v3409_v25, %v3407_v22 }
 0x107   :  { %4408 = vmatprep.subr.bf16.mxu0 %v4608_v2  ;;  %v1951_v27 = vpop.permute.xlu0 %1950 }
 0x108   :  { %3413 = vrot.lane.b32.xlu1 %v3411_v26, %s4613_s20  ;;  %v1953_v28 = vmul.f32 %v4667_v1, %v1951_v27 }
 0x109   :  { %v1955_v29 = vpop.permute.xlu1 %1954 }
 0x10a   :  { %v1957_v30 = vmul.f32 %v1955_v29, %v1953_v28 }
 0x10b   :  { %4091 = vmatmul.mubr.f32.vlgmr.msra.gmra.mrb[0].mxu1 %v583_v56  ;;  %4126 = vmatmul.mubr.f32.vlgmr.msra.gmra.mrb[2].mxu0 %v4756_v3  ;;  %v1959_v31 = vpop.permute.xlu0 %1958 }
 0x10c   :  { %4395 = vmatpush3.bf16.msra.mxu1 %v4685_v10  ;;  %4410 = vmatpush3.bf16.msra.mxu0 %v4688_v14  ;;  %v1961_v1 = vmul.f32 %v1959_v31, %v1957_v30 }
 0x10d   :  { %4097 = vmatprep.mubr.msk.f32.mxu1 %vm4609_vm1, %v4610_v7  ;;  %4132 = vmatprep.mubr.msk.f32.mxu0 %vm4609_vm1, %v4610_v7 }
 0x10e   :  { %4396 = vmatprep.subr.bf16.mxu1 %v4608_v2  ;;  %4411 = vmatprep.subr.bf16.mxu0 %v4608_v2  ;;  %v1963_v34 = vsel %vm27_vm2, %v1961_v1, 0 }
 0x10f   :  { %v4800_v36 = vand.u32 4294901760, %v1963_v34 }
 0x111   :  { %v2033_v38 = vsub.f32 %v1963_v34, %v4800_v36 }
 0x113   :  { %4098 = vmatmul.mubr.f32.vlgmr.msra.gmra.mrb[0].mxu1 %v584_v60  ;;  %4133 = vmatmul.mubr.f32.vlgmr.msra.gmra.mrb[2].mxu0 %v1067_v6  ;;  %v2034_v40 = vand.u32 4294901760, %v2033_v38 }
 0x114   :  { %4398 = vmatpush3.bf16.msra.mxu1 %v4695_v20  ;;  %4413 = vmatpush3.bf16.msra.mxu0 %v4685_v10 }
 0x115   :  { %4104 = vmatprep.mubr.msk.f32.mxu1 %vm4609_vm1, %v4610_v7  ;;  %4139 = vmatprep.mubr.msk.f32.mxu0 %vm4609_vm1, %v4610_v7  ;;  %v2035_v42 = vsub.f32 %v2033_v38, %v2034_v40 }
 0x116   :  { %4399 = vmatprep.subr.bf16.mxu1 %v4608_v2  ;;  %4414 = vmatprep.subr.bf16.mxu0 %v4608_v2 }
 0x117   :  { %v2036_v43 = vand.u32 4294901760, %v2035_v42 }
 0x11b   :  { %4105 = vmatmul.mubr.f32.vlgmr.msra.gmra.mrb[0].mxu1 %v4751_v55  ;;  %4140 = vmatmul.mubr.f32.vlgmr.msra.gmra.mrb[2].mxu0 %v1068_v11 }
 0x11c   :  { %4401 = vmatpush3.bf16.msra.mxu1 %v4685_v10  ;;  %4416 = vmatpush3.bf16.msra.mxu0 %v4695_v20 }
 0x11d   :  { %4111 = vmatprep.mubr.msk.f32.mxu1 %vm4609_vm1, %v4610_v7  ;;  %4146 = vmatprep.mubr.msk.f32.mxu0 %vm4609_vm1, %v4610_v7 }
 0x11e   :  { %4420 = vmatprep.subr.bf16.mxu1 %v4608_v2  ;;  %4417 = vmatprep.subr.bf16.mxu0 %v4608_v2 }
 0x123   :  { %4112 = vmatmul.mubr.f32.vlgmr.msra.gmra.mrb[0].mxu1 %v4751_v55  ;;  %4147 = vmatmul.mubr.f32.vlgmr.msra.gmra.mrb[2].mxu0 %v4756_v3 }
 0x124   :  { %4422 = vmatpush3.bf16.msra.mxu1 %v4685_v10  ;;  %4160 = vmatprep.mubr.msk.f32.mxu1 %vm4609_vm1, %v4610_v7 }
 0x125   :  { %4419 = vmatpush3.bf16.msra.mxu0 %v4685_v10  ;;  %4153 = vmatprep.mubr.msk.f32.mxu0 %vm4609_vm1, %v4610_v7 }
 0x126   :  { %4423 = vmatprep.subr.bf16.mxu1 %v4608_v2  ;;  %4438 = vmatprep.subr.bf16.mxu0 %v4608_v2 }
 0x127   :  { %4161 = vmatmul.mubr.f32.vlgmr.msra.gmra.mrb[2].mxu1 %v1554_v41 }
 0x128   :  { %4425 = vmatpush3.bf16.msra.mxu1 %v4693_v19  ;;  %4167 = vmatprep.mubr.msk.f32.mxu1 %vm4609_vm1, %v4610_v7 }
 0x129   :  { %4426 = vmatprep.subr.bf16.mxu1 %v4608_v2 }
 0x12b   :  { %4154 = vmatmul.mubr.f32.vlgmr.msra.gmra.mrb[2].mxu0 %v4756_v3 }
 0x12c   :  { %4440 = vmatpush3.bf16.msra.mxu0 %v4685_v10  ;;  %4202 = vmatprep.mubr.msk.f32.mxu0 %vm4609_vm1, %v4610_v7 }
 0x12d   :  { %4441 = vmatprep.subr.bf16.mxu0 %v4608_v2 }
 0x12f   :  { %4168 = vmatmul.mubr.f32.vlgmr.msra.gmra.mrb[2].mxu1 %v4789_v33  ;;  %4203 = vmatmul.mubr.f32.vlgmr.msra.gmra.mrb[4].mxu0 %v2036_v43 }
 0x130   :  { %4428 = vmatpush3.bf16.msra.mxu1 %v4688_v14  ;;  %4174 = vmatprep.mubr.msk.f32.mxu1 %vm4609_vm1, %v4610_v7 }
 0x131   :  { %4429 = vmatprep.subr.bf16.mxu1 %v4608_v2  ;;  %4443 = vmatpush3.bf16.msra.mxu0 %v4693_v19 }
 0x132   :  { %4209 = vmatprep.mubr.msk.f32.mxu0 %vm4609_vm1, %v4610_v7  ;;  %4444 = vmatprep.subr.bf16.mxu0 %v4608_v2 }
 0x137   :  { %4175 = vmatmul.mubr.f32.vlgmr.msra.gmra.mrb[2].mxu1 %v1551_v35  ;;  %4210 = vmatmul.mubr.f32.vlgmr.msra.gmra.mrb[4].mxu0 %v4800_v36 }
 0x138   :  { %4431 = vmatpush3.bf16.msra.mxu1 %v4685_v10  ;;  %4181 = vmatprep.mubr.msk.f32.mxu1 %vm4609_vm1, %v4610_v7 }
 0x139   :  { %4432 = vmatprep.subr.bf16.mxu1 %v4608_v2  ;;  %4446 = vmatpush3.bf16.msra.mxu0 %v4688_v14 }
 0x13a   :  { %4216 = vmatprep.mubr.msk.f32.mxu0 %vm4609_vm1, %v4610_v7  ;;  %4447 = vmatprep.subr.bf16.mxu0 %v4608_v2 }
 0x13f   :  { %4182 = vmatmul.mubr.f32.vlgmr.msra.gmra.mrb[2].mxu1 %v1552_v37  ;;  %4217 = vmatmul.mubr.f32.vlgmr.msra.gmra.mrb[4].mxu0 %v2033_v38 }
 0x140   :  { %4434 = vmatpush3.bf16.msra.mxu1 %v4695_v20  ;;  %4188 = vmatprep.mubr.msk.f32.mxu1 %vm4609_vm1, %v4610_v7 }
 0x141   :  { %4435 = vmatprep.subr.bf16.mxu1 %v4608_v2  ;;  %4449 = vmatpush3.bf16.msra.mxu0 %v4685_v10 }
 0x142   :  { %4223 = vmatprep.mubr.msk.f32.mxu0 %vm4609_vm1, %v4610_v7  ;;  %4450 = vmatprep.subr.bf16.mxu0 %v4608_v2 }
 0x147   :  { %4189 = vmatmul.mubr.f32.vlgmr.msra.gmra.mrb[2].mxu1 %v4789_v33  ;;  %4224 = vmatmul.mubr.f32.vlgmr.msra.gmra.mrb[4].mxu0 %v2034_v40 }
 0x148   :  { %4437 = vmatpush3.bf16.msra.mxu1 %v4685_v10  ;;  %4195 = vmatprep.mubr.msk.f32.mxu1 %vm4609_vm1, %v4610_v7 }
 0x149   :  { %4452 = vmatpush3.bf16.msra.mxu0 %v4695_v20  ;;  %4230 = vmatprep.mubr.msk.f32.mxu0 %vm4609_vm1, %v4610_v7 }
 0x14a   :  { %4453 = vmatprep.subr.bf16.mxu0 %v4608_v2  ;;  %4456 = vmatprep.subr.bf16.mxu1 %v4608_v2 }
 0x14f   :  { %4196 = vmatmul.mubr.f32.vlgmr.msra.gmra.mrb[2].mxu1 %v4789_v33  ;;  %4231 = vmatmul.mubr.f32.vlgmr.msra.gmra.mrb[4].mxu0 %v4800_v36 }
 0x150   :  { %4455 = vmatpush3.bf16.msra.mxu0 %v4685_v10  ;;  %4237 = vmatprep.mubr.msk.f32.mxu0 %vm4609_vm1, %v4610_v7 }
 0x151   :  { %4458 = vmatpush3.bf16.msra.mxu1 %v4685_v10  ;;  %4244 = vmatprep.mubr.msk.f32.mxu1 %vm4609_vm1, %v4610_v7 }
 0x152   :  { %4459 = vmatprep.subr.bf16.mxu1 %v4608_v2  ;;  %4474 = vmatprep.subr.bf16.mxu0 %v4608_v2 }
 0x157   :  { %4238 = vmatmul.mubr.f32.vlgmr.msra.gmra.mrb[4].mxu0 %v4800_v36 }
 0x158   :  { %4476 = vmatpush3.bf16.msra.mxu0 %v4685_v10  ;;  %4286 = vmatprep.mubr.msk.f32.mxu0 %vm4609_vm1, %v4610_v7 }
 0x159   :  { %4477 = vmatprep.subr.bf16.mxu0 %v4608_v2 }
 0x16a   :  { %v2446_v44 = vpop.permute.xlu1 %2445 }
 0x16b   :  { %v2447_v45 = vsel %vm27_vm2, %v2446_v44, 0 }
 0x16c   :  { %v2516_v46 = vand.u32 4294901760, %v2447_v45 }
 0x16e   :  { %v2517_v47 = vsub.f32 %v2447_v45, %v2516_v46 }
 0x170   :  { %v2518_v48 = vand.u32 4294901760, %v2517_v47 }
 0x172   :  { %v2519_v49 = vsub.f32 %v2517_v47, %v2518_v48 }
 0x174   :  { %v2520_v50 = vand.u32 4294901760, %v2519_v49 }
 0x176   :  { %4245 = vmatmul.mubr.f32.vlgmr.msra.gmra.mrb[4].mxu1 %v2520_v50 }
 0x177   :  { %4461 = vmatpush3.bf16.msra.mxu1 %v4693_v19  ;;  %4251 = vmatprep.mubr.msk.f32.mxu1 %vm4609_vm1, %v4610_v7 }
 0x178   :  { %v2930_v51 = vpop.permute.xlu0 %2929  ;;  %4462 = vmatprep.subr.bf16.mxu1 %v4608_v2 }
 0x179   :  { %v2931_v52 = vsel %vm27_vm2, %v2930_v51, 0 }
 0x17a   :  { %v4886_v53 = vand.u32 4294901760, %v2931_v52  ;;  %v3414_v58 = vpop.permute.xlu1 %3413 }
 0x17b   :  { %v3415_v59 = vsel %vm27_vm2, %v3414_v58, 0 }
 0x17c   :  { %v3001_v54 = vsub.f32 %v2931_v52, %v4886_v53  ;;  %v3484_v60 = vand.u32 4294901760, %v3415_v59 }
 0x17e   :  { %v3002_v55 = vand.u32 4294901760, %v3001_v54  ;;  %4252 = vmatmul.mubr.f32.vlgmr.msra.gmra.mrb[4].mxu1 %v2516_v46  ;;  %v3485_v62 = vsub.f32 %v3415_v59, %v3484_v60 }
 0x17f   :  { %4464 = vmatpush3.bf16.msra.mxu1 %v4688_v14  ;;  %4258 = vmatprep.mubr.msk.f32.mxu1 %vm4609_vm1, %v4610_v7 }
 0x180   :  { %v3003_v56 = vsub.f32 %v3001_v54, %v3002_v55  ;;  %4465 = vmatprep.subr.bf16.mxu1 %v4608_v2  ;;  %v3486_v0 = vand.u32 4294901760, %v3485_v62 }
 0x182   :  { %v3004_v57 = vand.u32 4294901760, %v3003_v56  ;;  %v3487_v3 = vsub.f32 %v3485_v62, %v3486_v0 }
 0x184   :  { %4287 = vmatmul.mubr.f32.vlgmr.msra.gmra.mrb[6].mxu0 %v3004_v57  ;;  %v3488_v4 = vand.u32 4294901760, %v3487_v3 }
 0x185   :  { %4479 = vmatpush3.bf16.msra.mxu0 %v4693_v19  ;;  %4293 = vmatprep.mubr.msk.f32.mxu0 %vm4609_vm1, %v4610_v7 }
 0x186   :  { %4259 = vmatmul.mubr.f32.vlgmr.msra.gmra.mrb[4].mxu1 %v2517_v47  ;;  %4480 = vmatprep.subr.bf16.mxu0 %v4608_v2 }
 0x187   :  { %4467 = vmatpush3.bf16.msra.mxu1 %v4685_v10  ;;  %4265 = vmatprep.mubr.msk.f32.mxu1 %vm4609_vm1, %v4610_v7 }
 0x188   :  { %4468 = vmatprep.subr.bf16.mxu1 %v4608_v2 }
 0x18c   :  { %4294 = vmatmul.mubr.f32.vlgmr.msra.gmra.mrb[6].mxu0 %v4886_v53 }
 0x18d   :  { %4482 = vmatpush3.bf16.msra.mxu0 %v4688_v14  ;;  %4300 = vmatprep.mubr.msk.f32.mxu0 %vm4609_vm1, %v4610_v7 }
 0x18e   :  { %4266 = vmatmul.mubr.f32.vlgmr.msra.gmra.mrb[4].mxu1 %v2518_v48  ;;  %4483 = vmatprep.subr.bf16.mxu0 %v4608_v2 }
 0x18f   :  { %4470 = vmatpush3.bf16.msra.mxu1 %v4695_v20  ;;  %4272 = vmatprep.mubr.msk.f32.mxu1 %vm4609_vm1, %v4610_v7 }
 0x190   :  { %4471 = vmatprep.subr.bf16.mxu1 %v4608_v2 }
 0x193   :  { %v490_v61 = vpop.f32.mrb[0].mxu0 }
 0x194   :  { %4301 = vmatmul.mubr.f32.vlgmr.msra.gmra.mrb[6].mxu0 %v3001_v54  ;;  %495 = vst.msk [vmem:[%s4978_s2] sm:$0xff] %vm494_vm3, %v490_v61  ;;  %v4071_v63 = vpop.f32.mrb[1].mxu0 }
 0x195   :  { %4485 = vmatpush3.bf16.msra.mxu0 %v4685_v10  ;;  %4307 = vmatprep.mubr.msk.f32.mxu0 %vm4609_vm1, %v4610_v7 }
 0x196   :  { %4273 = vmatmul.mubr.f32.vlgmr.msra.gmra.mrb[4].mxu1 %v2516_v46  ;;  %4486 = vmatprep.subr.bf16.mxu0 %v4608_v2 }
 0x197   :  { %4473 = vmatpush3.bf16.msra.mxu1 %v4685_v10  ;;  %4279 = vmatprep.mubr.msk.f32.mxu1 %vm4609_vm1, %v4610_v7 }
 0x198   :  { %4492 = vmatprep.subr.bf16.mxu1 %v4608_v2 }
 0x19c   :  { %4308 = vmatmul.mubr.f32.vlgmr.msra.gmra.mrb[6].mxu0 %v3002_v55 }
 0x19d   :  { %4488 = vmatpush3.bf16.msra.mxu0 %v4695_v20  ;;  %4314 = vmatprep.mubr.msk.f32.mxu0 %vm4609_vm1, %v4610_v7 }
 0x19e   :  { %4280 = vmatmul.mubr.f32.vlgmr.msra.gmra.mrb[4].mxu1 %v2516_v46  ;;  %4489 = vmatprep.subr.bf16.mxu0 %v4608_v2 }
 0x19f   :  { %4494 = vmatpush3.bf16.msra.mxu1 %v4685_v10  ;;  %4328 = vmatprep.mubr.msk.f32.mxu1 %vm4609_vm1, %v4610_v7 }
 0x1a0   :  { %4495 = vmatprep.subr.bf16.mxu1 %v4608_v2 }
 0x1a2   :  { %4329 = vmatmul.mubr.f32.vlgmr.msra.gmra.mrb[6].mxu1 %v3488_v4 }
 0x1a3   :  { %4497 = vmatpush3.bf16.msra.mxu1 %v4693_v19  ;;  %4335 = vmatprep.mubr.msk.f32.mxu1 %vm4609_vm1, %v4610_v7 }
 0x1a4   :  { %4315 = vmatmul.mubr.f32.vlgmr.msra.gmra.mrb[6].mxu0 %v4886_v53  ;;  %4498 = vmatprep.subr.bf16.mxu1 %v4608_v2 }
 0x1a5   :  { %4491 = vmatpush3.bf16.msra.mxu0 %v4685_v10  ;;  %4321 = vmatprep.mubr.msk.f32.mxu0 %vm4609_vm1, %v4610_v7 }
 0x1aa   :  { %4336 = vmatmul.mubr.f32.vlgmr.msra.gmra.mrb[6].mxu1 %v3484_v60 }
 0x1ab   :  { %4500 = vmatpush3.bf16.msra.mxu1 %v4688_v14  ;;  %4342 = vmatprep.mubr.msk.f32.mxu1 %vm4609_vm1, %v4610_v7 }
 0x1ac   :  { %4322 = vmatmul.mubr.f32.vlgmr.msra.gmra.mrb[6].mxu0 %v4886_v53  ;;  %4501 = vmatprep.subr.bf16.mxu1 %v4608_v2 }
 0x1b2   :  { %4343 = vmatmul.mubr.f32.vlgmr.msra.gmra.mrb[6].mxu1 %v3485_v62 }
 0x1b3   :  { %4503 = vmatpush3.bf16.msra.mxu1 %v4685_v10  ;;  %4349 = vmatprep.mubr.msk.f32.mxu1 %vm4609_vm1, %v4610_v7 }
 0x1b4   :  { %4504 = vmatprep.subr.bf16.mxu1 %v4608_v2 }
 0x1ba   :  { %4350 = vmatmul.mubr.f32.vlgmr.msra.gmra.mrb[6].mxu1 %v3486_v0 }
 0x1bb   :  { %4506 = vmatpush3.bf16.msra.mxu1 %v4695_v20  ;;  %4356 = vmatprep.mubr.msk.f32.mxu1 %vm4609_vm1, %v4610_v7 }
 0x1bc   :  { %4507 = vmatprep.subr.bf16.mxu1 %v4608_v2 }
 0x1c2   :  { %4357 = vmatmul.mubr.f32.vlgmr.msra.gmra.mrb[6].mxu1 %v3484_v60 }
 0x1c3   :  { %4509 = vmatpush3.bf16.msra.mxu1 %v4685_v10  ;;  %4363 = vmatprep.mubr.msk.f32.mxu1 %vm4609_vm1, %v4610_v7 }
 0x1ca   :  { %4364 = vmatmul.mubr.f32.vlgmr.msra.gmra.mrb[6].mxu1 %v3484_v60 }
 0x1f6   :  { %v970_v14 = vpop.f32.mrb[0].mxu1 }
 0x1f7   :  { %v4113_v19 = vpop.f32.mrb[1].mxu1  ;;  %975 = vrot.lane.b32.xlu0 %v970_v14, %s4614_s23 }
 0x1fe   :  { %v1454_v5 = vpop.f32.mrb[2].mxu0 }
 0x1ff   :  { %v4155_v6 = vpop.f32.mrb[3].mxu0  ;;  %1459 = vrot.lane.b32.xlu1 %v1454_v5, %s4615_s24 }
 0x222   :  { %v1938_v20 = vpop.f32.mrb[2].mxu1 }
 0x223   :  { %1943 = vrot.lane.b32.xlu0 %v1938_v20, %s4616_s25  ;;  %v4197_v8 = vpop.f32.mrb[3].mxu1 }
 0x22a   :  { %v2420_v2 = vpop.f32.mrb[4].mxu0 }
 0x22b   :  { %v4239_v9 = vpop.f32.mrb[5].mxu0  ;;  %2425 = vrot.lane.b32.xlu1 %v2420_v2, %s4613_s20 }
 0x269   :  { %v976_v10 = vpop.permute.xlu0 %975 }
 0x26a   :  { %979 = vst.msk [vmem:[%s4978_s2] sm:$0xff] %vm978_vm4, %v976_v10 }
 0x271   :  { %v2904_v7 = vpop.f32.mrb[4].mxu1  ;;  %v1460_v11 = vpop.permute.xlu1 %1459 }
 0x272   :  { %1463 = vst.msk [vmem:[%s4978_s2] sm:$0xff] %vm1462_vm5, %v1460_v11  ;;  %2909 = vrot.lane.b32.xlu0 %v2904_v7, %s4617_s30  ;;  %v4281_v12 = vpop.f32.mrb[5].mxu1 }
 0x27f   :  { %v3388_v13 = vpop.f32.mrb[6].mxu0 }
 0x280   :  { %3393 = vrot.lane.b32.xlu1 %v3388_v13, %s4618_s3  ;;  %v4323_v15 = vpop.f32.mrb[7].mxu0 }
 0x295   :  { %v1944_v16 = vpop.permute.xlu0 %1943 }
 0x296   :  { %1947 = vst.msk [vmem:[%s4978_s2] sm:$0xff] %vm1946_vm6, %v1944_v16 }
 0x29d   :  { %v3872_v17 = vpop.f32.mrb[6].mxu1  ;;  %v2426_v18 = vpop.permute.xlu1 %2425 }
 0x29e   :  { %3877 = vrot.lane.b32.xlu0 %v3872_v17, %s4619_s6  ;;  %v4365_v21 = vpop.f32.mrb[7].mxu1  ;;  %2429 = vst.msk [vmem:[%s4978_s2] sm:$0xff] %vm2428_vm7, %v2426_v18 }
 0x2e4   :  { %v2910_v22 = vpop.permute.xlu0 %2909 }
 0x2e5   :  { %2913 = vst.msk [vmem:[%s4978_s2] sm:$0xff] %vm2912_vm8, %v2910_v22 }
 0x2f2   :  { %v3394_v23 = vpop.permute.xlu1 %3393 }
 0x2f3   :  { %3397 = vst.msk [vmem:[%s4978_s2] sm:$0xff] %vm3396_vm9, %v3394_v23 }
 0x310   :  { %v3878_v24 = vpop.permute.xlu0 %3877 }
 0x311   :  { %3881 = vst.msk [vmem:[%s4978_s2] sm:$0xff] %vm3880_vm10, %v3878_v24 }

</bundles_post_ra>
